<compile_context>
chip_gen: v7x
topology: tpu7x:2x2x1
jax: 0.10.0
libtpu: 0.0.40
codegen_flags: <defaults>
</compile_context>

<pallas_src>
import functools

import jax
import jax.numpy as jnp
from jax import lax
from jax.experimental import pallas as pl
from jax.experimental.pallas import tpu as pltpu

_LANE = 128
_SUBLANE = 8
# ~0.5 MiB per input block: measured mem-bound sweet spot; tiny VMEM footprint.
_TARGET_BLOCK_BYTES = 512 * 1024
# Keep the parallel neuron axis shardable / pipelined.
_MIN_GRID_STEPS = 8
# If a (B, 128) block would exceed this, switch to the batch-chunked path.
_FULL_BATCH_BLOCK_LIMIT = 4 * 1024 * 1024


def _round_up(x, m):
    return (x + m - 1) // m * m


def _vmem_limit_bytes():
    """Generation-aware VMEM limit with >= 8 MiB headroom below the ceiling."""
    try:
        cap = int(pltpu.get_tpu_info().vmem_capacity_bytes)
    except Exception:
        cap = 64 * 1024 * 1024          # conservative (v7x per-TC) fallback
    return max(32 * 1024 * 1024, min(cap - 8 * 1024 * 1024, 96 * 1024 * 1024))


def _choose_tile_n_full(batch, n, itemsize):
    """Neuron tile for the full-batch path (lane-aligned, ~0.5 MiB/block)."""
    n128 = _round_up(n, _LANE)
    by_bytes = _TARGET_BLOCK_BYTES // max(1, batch * itemsize)
    tile = max(_LANE, (by_bytes // _LANE) * _LANE)
    # Keep >= _MIN_GRID_STEPS steps when N allows it (v7x has 2 TCs to feed).
    by_steps = _round_up(pl.cdiv(n128, _MIN_GRID_STEPS), _LANE)
    tile = min(tile, max(_LANE, by_steps))
    return min(tile, n128)


def _choose_chunked(batch, n, itemsize):
    """(tile_n, batch_chunk) for the batch-chunked path (tall inputs)."""
    n128 = _round_up(n, _LANE)
    tile_n = min(512, n128)
    sub = max(_SUBLANE, 32 // itemsize)       # (8,128) f32 / (16,128) bf16 tiling
    bc = _TARGET_BLOCK_BYTES // max(1, tile_n * itemsize)
    bc = max(sub, (bc // sub) * sub)
    bc = min(bc, _round_up(batch, sub))
    return tile_n, bc


def _corr_kernel(x_ref, y_ref, corr_ref, *, eps: float):
    """Full-batch, two-pass centered moments (matches PyTorch numerically)."""
    x = x_ref[...].astype(jnp.float32)        # (B, tn)
    y = y_ref[...].astype(jnp.float32)        # (B, tn)

    mx = jnp.mean(x, axis=0, keepdims=True)
    my = jnp.mean(y, axis=0, keepdims=True)
    dx = x - mx
    dy = y - my
    var_x = jnp.mean(dx * dx, axis=0, keepdims=True)
    var_y = jnp.mean(dy * dy, axis=0, keepdims=True)
    cov = jnp.mean(dx * dy, axis=0, keepdims=True)

    # rsqrt runs on the EUP slot; applying eps per factor keeps tiny variances
    # from flushing the denominator to zero.
    corr_ref[...] = cov * lax.rsqrt(var_x + eps) * lax.rsqrt(var_y + eps)


def _corr_kernel_chunked(x_ref, y_ref, corr_ref,
                         sx_ref, sy_ref, sxx_ref, syy_ref, sxy_ref,
                         *, eps: float, batch: int, chunk_b: int):
    """Batch-chunked raw-moment accumulation (for very tall inputs)."""
    j = pl.program_id(1)

    @pl.when(j == 0)
    def _():
        sx_ref[...] = jnp.zeros_like(sx_ref)
        sy_ref[...] = jnp.zeros_like(sy_ref)
        sxx_ref[...] = jnp.zeros_like(sxx_ref)
        syy_ref[...] = jnp.zeros_like(syy_ref)
        sxy_ref[...] = jnp.zeros_like(sxy_ref)

    x = x_ref[...].astype(jnp.float32)        # (bc, tn)
    y = y_ref[...].astype(jnp.float32)
    # Mask rows past B (edge chunk over-reads).  jnp.where so garbage (possibly
    # NaN/Inf) rows can never pollute the sums.
    row = j * chunk_b + lax.broadcasted_iota(jnp.int32, x.shape, 0)
    valid = row < batch
    x = jnp.where(valid, x, 0.0)
    y = jnp.where(valid, y, 0.0)

    sx_ref[...] += jnp.sum(x, axis=0, keepdims=True)
    sy_ref[...] += jnp.sum(y, axis=0, keepdims=True)
    sxx_ref[...] += jnp.sum(x * x, axis=0, keepdims=True)
    syy_ref[...] += jnp.sum(y * y, axis=0, keepdims=True)
    sxy_ref[...] += jnp.sum(x * y, axis=0, keepdims=True)

    @pl.when(j == pl.num_programs(1) - 1)
    def _():
        inv_b = jnp.float32(1.0 / batch)
        mx = sx_ref[...] * inv_b
        my = sy_ref[...] * inv_b
        var_x = sxx_ref[...] * inv_b - mx * mx
        var_y = syy_ref[...] * inv_b - my * my
        cov = sxy_ref[...] * inv_b - mx * my
        corr_ref[...] = cov * lax.rsqrt(var_x + eps) * lax.rsqrt(var_y + eps)


def correlation_loss_2d(output, target, *, eps=1e-16, per_neuron=False,
                        avg=False, tile_n=None, batch_chunk=None):
    assert output.shape == target.shape and output.ndim == 2
    B, N = output.shape
    itemsize = jnp.dtype(output.dtype).itemsize
    n128 = _round_up(N, _LANE)
    eps = float(eps)
    vmem_limit = _vmem_limit_bytes()

    use_chunked = (batch_chunk is not None) or (
        B * _LANE * itemsize > _FULL_BATCH_BLOCK_LIMIT)

    if not use_chunked:
        tn = _choose_tile_n_full(B, N, itemsize) if tile_n is None else \
            max(_LANE, _round_up(int(tile_n), _LANE))
        tn = min(tn, n128)
        grid = (pl.cdiv(N, tn),)    # no input padding; edge block over-reads
        corrs = pl.pallas_call(
            functools.partial(_corr_kernel, eps=eps),
            out_shape=jax.ShapeDtypeStruct((1, n128), jnp.float32),
            grid_spec=pltpu.PrefetchScalarGridSpec(
                num_scalar_prefetch=0,
                grid=grid,
                in_specs=[pl.BlockSpec((B, tn), lambda i: (0, i)),
                          pl.BlockSpec((B, tn), lambda i: (0, i))],
                out_specs=pl.BlockSpec((1, tn), lambda i: (0, i)),
            ),
            compiler_params=pltpu.CompilerParams(
                dimension_semantics=("parallel",),
                vmem_limit_bytes=vmem_limit),
        )(output, target)
    else:
        auto_tn, auto_bc = _choose_chunked(B, N, itemsize)
        tn = auto_tn if tile_n is None else max(_LANE, _round_up(int(tile_n), _LANE))
        tn = min(tn, n128)
        sub = max(_SUBLANE, 32 // itemsize)
        bc = auto_bc if batch_chunk is None else max(sub, _round_up(int(batch_chunk), sub))
        bc = min(bc, _round_up(B, sub))
        grid = (pl.cdiv(N, tn), pl.cdiv(B, bc))   # reduction (batch) axis last
        corrs = pl.pallas_call(
            functools.partial(_corr_kernel_chunked, eps=eps, batch=B, chunk_b=bc),
            out_shape=jax.ShapeDtypeStruct((1, n128), jnp.float32),
            grid_spec=pltpu.PrefetchScalarGridSpec(
                num_scalar_prefetch=0,
                grid=grid,
                in_specs=[pl.BlockSpec((bc, tn), lambda i, j: (j, i)),
                          pl.BlockSpec((bc, tn), lambda i, j: (j, i))],
                out_specs=pl.BlockSpec((1, tn), lambda i, j: (0, i)),
                scratch_shapes=[pltpu.VMEM((1, tn), jnp.float32)] * 5,
            ),
            compiler_params=pltpu.CompilerParams(
                dimension_semantics=("parallel", "arbitrary"),
                vmem_limit_bytes=vmem_limit),
        )(output, target)

    # Drop lane-padding / over-read columns BEFORE any reduction (they may hold
    # garbage-derived values, possibly non-finite).
    corrs = corrs[0, :N]
    if per_neuron:
        return -corrs
    loss = -jnp.sum(corrs)
    if avg:
        loss = loss / jnp.float32(N)
    return loss


def _reference(output, target, eps=1e-16, per_neuron=False, avg=False):
    output = output.astype(jnp.float32)
    target = target.astype(jnp.float32)
    dx = output - output.mean(axis=0, keepdims=True)
    dy = target - target.mean(axis=0, keepdims=True)
    vx = (dx ** 2).mean(axis=0, keepdims=True)
    vy = (dy ** 2).mean(axis=0, keepdims=True)
    corrs = (dx * dy).mean(axis=0, keepdims=True) / jnp.sqrt(
        (vx + eps) * (vy + eps))
    if not per_neuron:
        return -corrs.mean() if avg else -corrs.sum()
    return -corrs.reshape(-1)


if __name__ == "__main__":
    key = jax.random.PRNGKey(0)
    k1, k2, k3, k4, k5, k6, k7, k8 = jax.random.split(key, 8)

    # Small shapes consistent with the module: (batch, neurons).
    B, N = 8, 256
    output = jax.random.normal(k1, (B, N), dtype=jnp.float32)
    target = jax.random.normal(k2, (B, N), dtype=jnp.float32)

    loss = correlation_loss_2d(output, target)
    jax.block_until_ready(loss)
    assert jnp.allclose(loss, _reference(output, target), rtol=1e-5, atol=1e-5)

    loss_avg = correlation_loss_2d(output, target, avg=True)
    assert jnp.allclose(loss_avg, _reference(output, target, avg=True),
                        rtol=1e-5, atol=1e-5)

    per_neuron = correlation_loss_2d(output, target, per_neuron=True)
    assert jnp.allclose(per_neuron,
                        _reference(output, target, per_neuron=True),
                        rtol=1e-5, atol=1e-5)

    # Non-multiple-of-128 neuron count exercises the pad-free edge-block path.
    Bo, No = 8, 200
    out_o = jax.random.normal(k3, (Bo, No), dtype=jnp.float32)
    tgt_o = jax.random.normal(k4, (Bo, No), dtype=jnp.float32)
    loss_o = correlation_loss_2d(out_o, tgt_o)
    assert jnp.allclose(loss_o, _reference(out_o, tgt_o), rtol=1e-5, atol=1e-5)
    pn_o = correlation_loss_2d(out_o, tgt_o, per_neuron=True)
    assert pn_o.shape == (No,)
    assert jnp.allclose(pn_o, _reference(out_o, tgt_o, per_neuron=True),
                        rtol=1e-5, atol=1e-5)

    # bf16 inputs: DMA'd narrow, upcast in-kernel (half the HBM traffic).
    Bb, Nb = 16, 384
    out_b = jax.random.normal(k5, (Bb, Nb), dtype=jnp.float32).astype(jnp.bfloat16)
    tgt_b = jax.random.normal(k6, (Bb, Nb), dtype=jnp.float32).astype(jnp.bfloat16)
    loss_b = correlation_loss_2d(out_b, tgt_b)
    assert jnp.allclose(loss_b, _reference(out_b, tgt_b), rtol=1e-5, atol=1e-5)

    # Batch-chunked path (forced at a small shape): non-multiple-of-chunk B
    # exercises the masked edge chunk; raw-moment numerics -> slightly looser tol.
    Bc, Nc = 20, 200
    out_c = jax.random.normal(k7, (Bc, Nc), dtype=jnp.float32)
    tgt_c = jax.random.normal(k8, (Bc, Nc), dtype=jnp.float32)
    loss_c = correlation_loss_2d(out_c, tgt_c, batch_chunk=8)
    assert jnp.allclose(loss_c, _reference(out_c, tgt_c), rtol=1e-4, atol=2e-5)
    pn_c = correlation_loss_2d(out_c, tgt_c, batch_chunk=8, per_neuron=True)
    assert jnp.allclose(pn_c, _reference(out_c, tgt_c, per_neuron=True),
                        rtol=1e-4, atol=2e-5)

    jax.block_until_ready(pn_c)
    print("KERNEL_OK")
</pallas_src>

<mosaic_0001>
module attributes {stable_mosaic.version = 11 : i64} {
  func.func @_corr_kernel(%arg0: i32, %arg1: memref<8x128xf32, #tpu.memory_space<vmem>>, %arg2: memref<8x128xf32, #tpu.memory_space<vmem>>, %arg3: memref<1x128xf32, #tpu.memory_space<vmem>>) attributes {dimension_semantics = [#tpu.dimension_semantics<parallel>], iteration_bounds = array<i64: 2>, scalar_prefetch = 0 : i64, scratch_operands = 0 : i64, tpu.core_type = #tpu.core_type<tc>, window_params = [{transform_indices = @transform_0, window_bounds = array<i64: 8, 128>}, {transform_indices = @transform_1, window_bounds = array<i64: 8, 128>}, {transform_indices = @transform_2, window_bounds = array<i64: 1, 128>}]} {
    %c0 = arith.constant 0 : index
    %c0_0 = arith.constant 0 : index
    %0 = vector.load %arg1[%c0, %c0_0] : memref<8x128xf32, #tpu.memory_space<vmem>>, vector<8x128xf32>
    %c0_1 = arith.constant 0 : index
    %c0_2 = arith.constant 0 : index
    %1 = vector.load %arg2[%c0_1, %c0_2] : memref<8x128xf32, #tpu.memory_space<vmem>>, vector<8x128xf32>
    %cst = arith.constant dense<0.000000e+00> : vector<128xf32>
    %2 = vector.multi_reduction <add>, %0, %cst [0] : vector<8x128xf32> to vector<128xf32>
    %3 = vector.shape_cast %2 : vector<128xf32> to vector<1x128xf32>
    %cst_3 = arith.constant 8.000000e+00 : f32
    %4 = vector.broadcast %cst_3 : f32 to vector<1x128xf32>
    %5 = arith.divf %3, %4 : vector<1x128xf32>
    %cst_4 = arith.constant dense<0.000000e+00> : vector<128xf32>
    %6 = vector.multi_reduction <add>, %1, %cst_4 [0] : vector<8x128xf32> to vector<128xf32>
    %7 = vector.shape_cast %6 : vector<128xf32> to vector<1x128xf32>
    %cst_5 = arith.constant 8.000000e+00 : f32
    %8 = vector.broadcast %cst_5 : f32 to vector<1x128xf32>
    %9 = arith.divf %7, %8 : vector<1x128xf32>
    %10 = vector.broadcast %5 : vector<1x128xf32> to vector<8x128xf32>
    %11 = arith.subf %0, %10 : vector<8x128xf32>
    %12 = vector.broadcast %9 : vector<1x128xf32> to vector<8x128xf32>
    %13 = arith.subf %1, %12 : vector<8x128xf32>
    %14 = arith.mulf %11, %11 : vector<8x128xf32>
    %cst_6 = arith.constant dense<0.000000e+00> : vector<128xf32>
    %15 = vector.multi_reduction <add>, %14, %cst_6 [0] : vector<8x128xf32> to vector<128xf32>
    %16 = vector.shape_cast %15 : vector<128xf32> to vector<1x128xf32>
    %cst_7 = arith.constant 8.000000e+00 : f32
    %17 = vector.broadcast %cst_7 : f32 to vector<1x128xf32>
    %18 = arith.divf %16, %17 : vector<1x128xf32>
    %19 = arith.mulf %13, %13 : vector<8x128xf32>
    %cst_8 = arith.constant dense<0.000000e+00> : vector<128xf32>
    %20 = vector.multi_reduction <add>, %19, %cst_8 [0] : vector<8x128xf32> to vector<128xf32>
    %21 = vector.shape_cast %20 : vector<128xf32> to vector<1x128xf32>
    %cst_9 = arith.constant 8.000000e+00 : f32
    %22 = vector.broadcast %cst_9 : f32 to vector<1x128xf32>
    %23 = arith.divf %21, %22 : vector<1x128xf32>
    %24 = arith.mulf %11, %13 : vector<8x128xf32>
    %cst_10 = arith.constant dense<0.000000e+00> : vector<128xf32>
    %25 = vector.multi_reduction <add>, %24, %cst_10 [0] : vector<8x128xf32> to vector<128xf32>
    %26 = vector.shape_cast %25 : vector<128xf32> to vector<1x128xf32>
    %cst_11 = arith.constant 8.000000e+00 : f32
    %27 = vector.broadcast %cst_11 : f32 to vector<1x128xf32>
    %28 = arith.divf %26, %27 : vector<1x128xf32>
    %cst_12 = arith.constant 1.000000e-16 : f32
    %29 = vector.broadcast %cst_12 : f32 to vector<1x128xf32>
    %30 = arith.addf %18, %29 : vector<1x128xf32>
    %31 = math.rsqrt %30 : vector<1x128xf32>
    %32 = arith.mulf %28, %31 : vector<1x128xf32>
    %cst_13 = arith.constant 1.000000e-16 : f32
    %33 = vector.broadcast %cst_13 : f32 to vector<1x128xf32>
    %34 = arith.addf %23, %33 : vector<1x128xf32>
    %35 = math.rsqrt %34 : vector<1x128xf32>
    %36 = arith.mulf %32, %35 : vector<1x128xf32>
    %c0_14 = arith.constant 0 : index
    %c0_15 = arith.constant 0 : index
    %37 = vector.load %arg3[%c0_14, %c0_15] : memref<1x128xf32, #tpu.memory_space<vmem>>, vector<1x128xf32>
    tpu.vector_store %arg3[%c0_14, %c0_15], %36 {strides = array<i32>} : memref<1x128xf32, #tpu.memory_space<vmem>>, vector<1x128xf32>,
    return
  }
  func.func @transform_0(%arg0: i32) -> (i32, i32) {
    %c0_i32 = arith.constant 0 : i32
    %c0_i32_0 = arith.constant 0 : i32
    return %c0_i32, %arg0 : i32, i32
  }
  func.func @transform_1(%arg0: i32) -> (i32, i32) {
    %c0_i32 = arith.constant 0 : i32
    %c0_i32_0 = arith.constant 0 : i32
    return %c0_i32, %arg0 : i32, i32
  }
  func.func @transform_2(%arg0: i32) -> (i32, i32) {
    %c0_i32 = arith.constant 0 : i32
    %c0_i32_0 = arith.constant 0 : i32
    return %c0_i32, %arg0 : i32, i32
  }
}

</mosaic_0001>

<bundles_post_ra>
// kernel: tpu_custom_call.1
= control target key start
LH: loop header
LB: loop body
LE: loop exit
PB: predicated region body
PF: predicated region fallthrough
CT: control target
= control target key end

     0   :  { %7 = vsyncpa [#allocation3], 0  ;;  %s775_s0 = inlined_call_operand.hbm [shape: f32[8,256], index: 0, kind: input, shape index: {}]   ;;  %s776_s1 = inlined_call_operand.hbm [shape: f32[8,256], index: 1, kind: input, shape index: {}]   ;;  %s777_s2 = inlined_call_operand.hbm [shape: f32[1,256], index: 2, kind: output, shape index: {}]  }
   0x1   :  { %9 = vsyncpa [#allocation3 + $0x1], 0 }
   0x2   :  { %10 = vsyncpa [#allocation6], 0 }
   0x3   :  { %12 = vsyncpa [#allocation6 + $0x1], 0 }
   0x4   :  { %13 = vsyncpa [#allocation4], 0 }
   0x5   :  { %15 = vsyncpa [#allocation4 + $0x1], 0  ;;  %s565_s9 = smov 0   ;;  %s567_s10 = smov 0  }
   0x6   :  { %s569_s11 = smov 0   ;;  %s571_s12 = smov 0  }
   0x7 LB: > { %s586_s13 = sadd.s32 4294967295, %s545_s12   ;;  %s347_s14 = sadd.s32 4294967294, %s545_s12   ;;  %s545_s12 = sphi %s571_s12, %s796_s12   ;;  %s541_s11 = sphi %s569_s11, %s795_s11   ;;  %s537_s10 = sphi %s567_s10, %s794_s10   ;;  %s533_s9 = sphi %s565_s9, %s793_s9  }
   0x8   : > { %s590_s15 = sadd.s32 1, %s545_s12   ;;  %s28_s16 = sadd.s32 1, %s541_s11 }
   0x9   : > { %s25_s17 = ssub.s32 %s545_s12, %s590_s15  ;;  %p35_p0 = scmp.ne.s32.totalorder %s541_s11, %s537_s10 }
   0xa   : > { %p26_p1 = scmp.eq.s32.totalorder %s25_s17, 0  ;;  %p36_p2 = scmp.eq.s32.totalorder %s545_s12, 0 }
   0xb   : > { %p41_p3 = scmp.ne.s32.totalorder %s537_s10, %s533_s9  ;;  %p42_p4 = scmp.eq.s32.totalorder %s586_s13, 0 }
   0xc   : > { %s602_s18 = scalar_select %p26_p1, %s541_s11, %s28_s16  }
   0xd   : > { %p604_p5 = por %p36_p2, %p35_p0  ;;  %p608_p6 = por %p42_p4, %p41_p3 }
   0xe   : > { %p91_p7 = scmp.eq.s32.totalorder %s586_s13, 1  ;;  %p97_p8 = scmp.eq.s32.totalorder %s347_s14, 1 }
   0xf   : > { %s781_s20 = scalar_select %p608_p6, 1, 0 }
  0x10   : > { %p377_p10 = scmp.lt.s32.totalorder %s545_s12, 2  ;;  %p615_p11 = por %p91_p7, %p35_p0 }
  0x11   : > { %p619_p12 = por %p97_p8, %p41_p3  ;;  %s624_s23 = sand.u32 1, %s541_s11  }
  0x12   : > { %s782_s21 = scalar_select %p615_p11, 1, 0 }
  0x13   : > { %s783_s22 = scalar_select %p619_p12, 1, 0 }
  0x14   : > { %s351_s24 = sshll.u32 %s545_s12, 7  ;;  %s350_s25 = sshll.u32 %s624_s23, 3 }
  0x15   : > { %s633_s28 = scalar_lea.hbm %s775_s0, %s351_s24  ;;  %s121_s29 = scalar_lea.vmem [#allocation2], %s350_s25 }
  0x16   : > { %s128_s30 = sshll.u32 %s121_s29, 4  ;;  %p639_p13 = pnand %p377_p10, %p604_p5  ;;  %s643_s30 = int_to_ptr.vmem [resolvable:$true] %s128_s30 }
  0x17   : > { %s118_s4 = scalar_lea.sflag [#allocation3], %s624_s23  ;;  %s415_s5 = scalar_lea.hbm %s633_s28, 128 }
  0x18   : > { %p416_p2 = scmp.ne.s32.totalorder %s633_s28, %s415_s5  ;;  %p417_p3 = pneg %p639_p13 }
  0x19   : > { %s420_s8 = scalar_lea.hbm %s775_s0, 256  ;;  %p421_p5 = scmp.lt.u32.totalorder %s633_s28, %s775_s0 }
  0x1a   : > { %p418_p4 = pnand %p417_p3, %p416_p2  ;;  %p422_p8 = scmp.lt.u32.totalorder %s420_s8, %s415_s5 }
  0x1b   : > { %p424_p9 = scmp.lt.u32.totalorder %s415_s5, %s633_s28 }
  0x1c   : > { %p419_p7 = pneg %p418_p4  ;;  %p423_p10 = por %p422_p8, %p421_p5 }
  0x1e   : > { %p425_p0 = por %p424_p9, %p423_p10 }
  0x20   : > { %p426_p1 = pnand %p425_p0, %p419_p7 }
  0x22   : > { %429 = shalt.err (!%p426_p1)
}
  0x23   : > { %s430_s17 = scalar_lea.vmem %s643_s30, 128  ;;  %s547_s19 = smov [#allocation2]  }
  0x24   : > { %p431_p2 = scmp.ne.s32.totalorder %s643_s30, %s430_s17  ;;  %s435_s26 = sshll.u32 %s547_s19, 4  ;;  %s436_s26 = int_to_ptr.vmem [resolvable:$false] %s435_s26 }
  0x25   : > { %s437_s27 = scalar_lea.vmem %s436_s26, 256  ;;  %p438_p11 = scmp.lt.s32.totalorder %s643_s30, %s436_s26 }
  0x26   : > { %p433_p4 = pnand %p431_p2, %p417_p3  ;;  %p439_p5 = scmp.lt.s32.totalorder %s437_s27, %s430_s17 }
  0x28   : > { %p434_p12 = pneg %p433_p4  ;;  %p440_p8 = por %p439_p5, %p438_p11 }
  0x2a   : > { %p441_p9 = pnand %p440_p8, %p434_p12 }
  0x2c   : > { %444 = shalt.err (!%p441_p9)
}
  0x2d   : > { %369 = dma.hbm_to_vmem [thread:$0]  (!%p639_p13), %s633_s28, 128, %s643_s30, %s118_s4  }
  0x2e   : > { %p785_p0 = scmp.lt.s32.totalorder %s545_s12, 3  ;;  %p786_p1 = scmp.ge.s32.totalorder %s545_s12, 1 }
  0x2f   : > { %s686_s7 = scalar_lea.hbm %s776_s1, %s351_s24  ;;  %s139_s8 = scalar_lea.vmem [#allocation5], %s350_s25 }
  0x30   : > { %p677_p7 = pnand %p786_p1, %p785_p0  ;;  %s146_s14 = sshll.u32 %s139_s8, 4  ;;  %s147_s14 = int_to_ptr.vmem [resolvable:$true] %s146_s14 }
  0x31   : > { %s136_s28 = scalar_lea.sflag [#allocation6], %s624_s23  ;;  %s445_s30 = scalar_lea.hbm %s686_s7, 128 }
  0x32   : > { %s787_s29 = scalar_select %p677_p7, 1, 0 }
  0x33   : > { %p446_p11 = scmp.ne.s32.totalorder %s686_s7, %s445_s30  ;;  %s450_s24 = scalar_lea.hbm %s776_s1, 256 }
  0x34   : > { %p451_p2 = scmp.lt.u32.totalorder %s686_s7, %s776_s1  ;;  %p452_p4 = scmp.lt.u32.totalorder %s450_s24, %s445_s30 }
  0x35   : > { %p448_p12 = pnand %p446_p11, %p417_p3  ;;  %p454_p8 = scmp.lt.u32.totalorder %s445_s30, %s686_s7 }
  0x36   : > { %p453_p5 = por %p452_p4, %p451_p2 }
  0x37   : > { %p449_p10 = pneg %p448_p12 }
  0x38   : > { %p455_p9 = por %p454_p8, %p453_p5 }
  0x3a   : > { %p456_p0 = pnand %p455_p9, %p449_p10 }
  0x3c   : > { %459 = shalt.err (!%p456_p0)
}
  0x3d   : > { %s460_s23 = scalar_lea.vmem %s147_s14, 128  ;;  %s548_s25 = smov [#allocation5]  }
  0x3e   : > { %p461_p1 = scmp.ne.s32.totalorder %s147_s14, %s460_s23  ;;  %s465_s26 = sshll.u32 %s548_s25, 4  ;;  %s466_s26 = int_to_ptr.vmem [resolvable:$false] %s465_s26 }
  0x3f   : > { %s467_s27 = scalar_lea.vmem %s466_s26, 256  ;;  %p468_p6 = scmp.lt.s32.totalorder %s147_s14, %s466_s26 }
  0x40   : > { %p463_p11 = pnand %p461_p1, %p417_p3  ;;  %p469_p7 = scmp.lt.s32.totalorder %s467_s27, %s460_s23 }
  0x42   : > { %p464_p12 = pneg %p463_p11  ;;  %p470_p2 = por %p469_p7, %p468_p6 }
  0x44   : > { %p471_p4 = pnand %p470_p2, %p464_p12 }
  0x46   : > { %474 = shalt.err (!%p471_p4)
}
  0x47   : > { %372 = dma.hbm_to_vmem [thread:$0]  (!%p639_p13), %s686_s7, 128, %s147_s14, %s136_s28  }
  0x48   : > { %p788_p10 = scmp.ne.s32.totalorder %s787_s29, 0 }
  0x49   : > { %s713_s5 = sand.u32 (!%p788_p10), 1, %s537_s10   ;;  %p789_p3 = scmp.ne.s32.totalorder (!%p788_p10), %s781_s20, 0 }
  0x4a   : > { %155 = sbr.rel (%p788_p10) target bundleno = 148 (0x94), region = 28  ;;  %s355_s6 = sshll.u32 (!%p788_p10), %s713_s5, 3 }
  0x4b   : > { %s158_s8 = scalar_lea.sflag (!%p788_p10), [#allocation3], %s713_s5  ;;  %s161_s30 = scalar_lea.vmem (!%p788_p10), [#allocation2], %s355_s6 }
  0x51   : > { %520 = dma.done.wait (%p789_p3), %s158_s8, 128  }
  0x52   : > { %522 = vsyncadd (%p789_p3), %s158_s8, 4294967168  ;;  %s167_s3 = scalar_lea.sflag [#allocation6], %s713_s5  ;;  %s170_s7 = scalar_lea.vmem [#allocation5], %s355_s6 }
  0x53   : > { %524 = dma.done.wait (%p789_p3), %s167_s3, 128  }
  0x54   : > { %526 = vsyncadd (%p789_p3), %s167_s3, 4294967168  ;;  %v195_v0 = vld [vmem:[%s161_s30] sm:$0xff]  ;;  %v196_v1 = vld [vmem:[%s170_s7] sm:$0xff]  ;;  %s194_s20 = scalar_lea.vmem [#allocation7], %s713_s5  ;;  %s357_s14 = sshll.u32 %s586_s13, 4 }
  0x55   : > { %v197_v2 = vrot.slane %v195_v0, 4  ;;  %v205_v3 = vrot.slane %v196_v1, 4  ;;  %s258_s29 = sshll.u32 %s194_s20, 4  ;;  %s733_s16 = scalar_lea.hbm %s777_s2, %s357_s14  ;;  %s728_s29 = int_to_ptr.vmem [resolvable:$true] %s258_s29 }
  0x56   : > { %s246_s24 = scalar_lea.sflag [#allocation4], %s713_s5  ;;  %s475_s17 = scalar_lea.vmem %s728_s29, 16 }
  0x57   : > { %v198_v4 = vadd.f32 %v197_v2, %v195_v0  ;;  %v206_v5 = vadd.f32 %v205_v3, %v196_v1  ;;  %p476_p6 = scmp.ne.s32.totalorder %s728_s29, %s475_s17  ;;  %p790_p13 = scmp.ne.s32.totalorder %s782_s21, 0 }
  0x58   : > { %s549_s13 = smov [#allocation7]  }
  0x59   : > { %v199_v6 = vrot.slane %v198_v4, 2  ;;  %v207_v7 = vrot.slane %v206_v5, 2  ;;  %p477_p7 = pnand %p476_p6, %p790_p13  ;;  %s479_s19 = sshll.u32 %s549_s13, 4  ;;  %s480_s19 = int_to_ptr.vmem [resolvable:$false] %s479_s19 }
  0x5a   : > { %s481_s23 = scalar_lea.vmem %s480_s19, 32  ;;  %p482_p8 = scmp.lt.s32.totalorder %s728_s29, %s480_s19 }
  0x5b   : > { %v200_v8 = vadd.f32 %v199_v6, %v198_v4  ;;  %v208_v9 = vadd.f32 %v207_v7, %v206_v5  ;;  %p478_p5 = pneg %p477_p7  ;;  %p483_p9 = scmp.lt.s32.totalorder %s481_s23, %s475_s17 }
  0x5d   : > { %v201_v10 = vrot.slane %v200_v8, 1  ;;  %v209_v11 = vrot.slane %v208_v9, 1  ;;  %p484_p0 = por %p483_p9, %p482_p8 }
  0x5f   : > { %v202_v12 = vadd.f32 %v201_v10, %v200_v8  ;;  %v210_v13 = vadd.f32 %v209_v11, %v208_v9  ;;  %p485_p1 = pnand %p484_p0, %p478_p5 }
  0x61   : > { %v204_v14 = vmul.f32 0.125, %v202_v12  ;;  %v211_v15 = vmul.f32 0.125, %v210_v13 }
  0x63   : > { %v212_v16 = vsub.f32 %v195_v0, %v204_v14  ;;  %v213_v17 = vsub.f32 %v196_v1, %v211_v15 }
  0x65   : > { %v214_v18 = vmul.f32 %v212_v16, %v212_v16  ;;  %v222_v19 = vmul.f32 %v213_v17, %v213_v17  ;;  %v230_v20 = vmul.f32 %v213_v17, %v212_v16 }
  0x67   : > { %v215_v21 = vrot.slane %v214_v18, 4  ;;  %v223_v22 = vrot.slane %v222_v19, 4  ;;  %v231_v23 = vrot.slane %v230_v20, 4 }
  0x69   : > { %v216_v24 = vadd.f32 %v215_v21, %v214_v18  ;;  %v224_v25 = vadd.f32 %v223_v22, %v222_v19  ;;  %v232_v26 = vadd.f32 %v231_v23, %v230_v20 }
  0x6b   : > { %v217_v27 = vrot.slane %v216_v24, 2  ;;  %v225_v28 = vrot.slane %v224_v25, 2  ;;  %v233_v31 = vrot.slane %v232_v26, 2 }
  0x6d   : > { %v218_v29 = vadd.f32 %v217_v27, %v216_v24  ;;  %v226_v30 = vadd.f32 %v225_v28, %v224_v25  ;;  %v234_v36 = vadd.f32 %v233_v31, %v232_v26 }
  0x6f   : > { %v219_v32 = vrot.slane %v218_v29, 1  ;;  %v227_v33 = vrot.slane %v226_v30, 1  ;;  %v235_v41 = vrot.slane %v234_v36, 1 }
  0x71   : > { %v220_v34 = vadd.f32 %v219_v32, %v218_v29  ;;  %v228_v35 = vadd.f32 %v227_v33, %v226_v30  ;;  %v236_v42 = vadd.f32 %v235_v41, %v234_v36 }
  0x73   : > { %v221_v37 = vmul.f32 0.125, %v220_v34  ;;  %v229_v38 = vmul.f32 0.125, %v228_v35  ;;  %v237_v43 = vmul.f32 0.125, %v236_v42 }
  0x75   : > { %v238_v39 = vadd.f32 1e-16, %v221_v37  ;;  %v241_v40 = vadd.f32 1e-16, %v229_v38 }
  0x77   : > { %411 = vrsqrt.f32 %v238_v39 }
  0x78   : > { %413 = vrsqrt.f32 %v241_v40 }
  0x81   : > { %v412_v44 = vpop.eup %411 }
  0x82   : > { %v414_v45 = vpop.eup %413  ;;  %v240_v46 = vmul.f32 %v412_v44, %v237_v43 }
  0x84   : > { %v243_v47 = vmul.f32 %v414_v45, %v240_v46 }
  0x86   : > { %244 = vst [vmem:[%s194_s20] sm:$0x1] %v243_v47 }
  0x87   : > { %488 = shalt.err (!%p485_p1)
}
  0x88   : > { %s489_s25 = scalar_lea.hbm %s733_s16, 16  ;;  %s493_s5 = scalar_lea.hbm %s777_s2, 32 }
  0x89   : > { %p490_p11 = scmp.ne.s32.totalorder %s733_s16, %s489_s25  ;;  %p494_p4 = scmp.lt.u32.totalorder %s733_s16, %s777_s2 }
  0x8a   : > { %p495_p10 = scmp.lt.u32.totalorder %s493_s5, %s489_s25  ;;  %p497_p6 = scmp.lt.u32.totalorder %s489_s25, %s733_s16 }
  0x8b   : > { %p491_p12 = pnand %p490_p11, %p790_p13 }
  0x8c   : > { %p496_p3 = por %p495_p10, %p494_p4 }
  0x8d   : > { %p492_p2 = pneg %p491_p12 }
  0x8e   : > { %p498_p7 = por %p497_p6, %p496_p3 }
  0x90   : > { %p499_p5 = pnand %p498_p7, %p492_p2 }
  0x92   : > { %502 = shalt.err (!%p499_p5)
}
  0x93   : > { %364 = dma.vmem_to_hbm [thread:$0]  (%p790_p13), %s728_s29, 16, %s733_s16, %s246_s24  }
  0x94 PF: > { %s270_s30 = sand.u32 1, %s533_s9   ;;  %p791_p8 = scmp.ne.s32.totalorder %s783_s22, 0 }
  0x95   : > { %p792_p9 = scmp.ge.s32.totalorder %s545_s12, 2  ;;  %s271_s3 = scalar_lea.sflag [#allocation4], %s270_s30 }
  0x97   : > { %p374_p0 = pnand %p792_p9, %p791_p8 }
  0x99   : > { %528 = dma.done.wait (!%p374_p0), %s271_s3, 16  }
  0x9a   : > { %530 = vsyncadd (!%p374_p0), %s271_s3, 4294967280  ;;  %p18_p1 = scmp.ge.s32.totalorder %s590_s15, 4   ;;  %s793_s9 = smov %s537_s10 }
  0x9b   : > { %s794_s10 = smov %s541_s11  ;;  %s795_s11 = smov %s602_s18 }
  0x9c   : > { %s796_s12 = smov %s590_s15  ;;  %20 = sbr.rel (!%p18_p1) target bundleno = 7 (0x7), region = 86 }
  0xa3   :  { %275 = vsyncpa [#allocation3], 1 }
  0xa4   :  { %277 = vsyncpa [#allocation3 + $0x1], 1 }
  0xa5   :  { %278 = vsyncpa [#allocation6], 1 }
  0xa6   :  { %280 = vsyncpa [#allocation6 + $0x1], 1 }
  0xa7   :  { %281 = vsyncpa [#allocation4], 1 }
  0xa8   :  { %283 = vsyncpa [#allocation4 + $0x1], 1 }

</bundles_post_ra>
